<compile_context>
chip_gen: v5e
topology: v5e:2x2
jax: 0.10.0
libtpu: 0.0.40
codegen_flags: <defaults>
</compile_context>

<pallas_src>
import jax
import jax.numpy as jnp
from jax.experimental import pallas as pl
from jax.experimental.pallas import tpu as pltpu

_LANES = 128


def _sdice_partial_kernel(pred_ref, gt_ref, out_ref):
    """pred_ref, gt_ref: (TILE_R, 128) lane-dense blocks (classes interleaved along lanes).

    out_ref: (24, 128) per-core partial sums, resident in VMEM across the reduction axis:
      rows  0: 8 -> ref_vol   partials (sum of ground)
      rows  8:16 -> intersect partials (sum of ground * pred)
      rows 16:24 -> seg_vol   partials (sum of pred)
    """
    t = pl.program_id(1)

    p = pred_ref[...].astype(jnp.float32)
    g = gt_ref[...].astype(jnp.float32)
    rows = p.shape[0]

    # Fold the tile down to one (8, 128) vreg per quantity with pure VPU adds.
    # The reshape keeps (8, 128) tiles intact, so it is layout-preserving.
    g8 = jnp.sum(g.reshape(rows // 8, 8, _LANES), axis=0)
    i8 = jnp.sum((g * p).reshape(rows // 8, 8, _LANES), axis=0)
    p8 = jnp.sum(p.reshape(rows // 8, 8, _LANES), axis=0)

    @pl.when(t == 0)
    def _init():
        out_ref[...] = jnp.zeros_like(out_ref)

    out_ref[0:8, :] += g8
    out_ref[8:16, :] += i8
    out_ref[16:24, :] += p8


def _round_up(x, m):
    return (x + m - 1) // m * m


def sdice_loss(preds, targets, *, tile_rows=2048, num_cores=2):
    """Soft Dice loss, identical semantics to SDiceLoss.forward with weight_map=None.

    preds:   (N, C, H, W) or (N, C, D, H, W) class probabilities (channel second, PyTorch layout).
    targets: one-hot ground truth with channel LAST (matches targets.view(-1, C)).
    """
    # TODO(synk): weight_map branch of SDiceLoss.forward not implemented (weight_map=None only).
    C = preds.shape[1]
    assert _LANES % C == 0, "num_class must divide 128 for the lane-dense layout"

    # Channel-last, then flatten.  (Extra XLA transpose pass for preds — see file header.)
    pred_flat = jnp.moveaxis(preds, 1, -1).reshape(-1)
    gt_flat = targets.reshape(-1)
    total = pred_flat.shape[0]  # = n_voxels * C

    # Lane-dense tiling: rows of 128 interleaved class values.
    rows_raw = -(-total // _LANES)
    rows_per_core = -(-rows_raw // num_cores)
    tile_r = min(_round_up(tile_rows, 32), _round_up(rows_per_core, 32))
    tiles_per_core = -(-rows_per_core // tile_r)
    rows_padded = num_cores * tiles_per_core * tile_r
    pad = rows_padded * _LANES - total
    if pad:
        # Zero padding is exact: zeros contribute nothing to any of the three sums.
        pred_flat = jnp.pad(pred_flat, (0, pad))
        gt_flat = jnp.pad(gt_flat, (0, pad))
    pred2 = pred_flat.reshape(rows_padded, _LANES)
    gt2 = gt_flat.reshape(rows_padded, _LANES)

    grid = (num_cores, tiles_per_core)
    in_map = lambda p, t: (p * tiles_per_core + t, 0)

    # VMEM footprint: 2 inputs x 2 buffers x tile_r*128*4B (~4 MiB at tile_r=2048) —
    # safely under the default scoped-VMEM limit on v5e/v6e/v7x; no vmem_limit override needed.
    partials = pl.pallas_call(
        _sdice_partial_kernel,
        out_shape=jax.ShapeDtypeStruct((num_cores * 24, _LANES), jnp.float32),
        grid_spec=pltpu.PrefetchScalarGridSpec(
            num_scalar_prefetch=0,
            grid=grid,
            in_specs=[
                pl.BlockSpec((tile_r, _LANES), in_map),
                pl.BlockSpec((tile_r, _LANES), in_map),
            ],
            out_specs=pl.BlockSpec((24, _LANES), lambda p, t: (p, 0)),
        ),
        compiler_params=pltpu.CompilerParams(
            dimension_semantics=("parallel", "arbitrary"),
        ),
    )(pred2, gt2)

    # Combine per-core / per-sublane / per-lane-group partials back to per-class sums.
    partials = partials.reshape(num_cores, 3, 8, _LANES // C, C)
    sums = jnp.sum(partials, axis=(0, 2, 3))  # (3, C)
    ref_vol, intersect, seg_vol = sums[0], sums[1], sums[2]
    dice_score = (2.0 * intersect + 1e-05) / (ref_vol + seg_vol + 1.0 + 1e-05)
    return jnp.mean(-jnp.log(dice_score))


def sdice_loss_ref(preds, targets):
    C = preds.shape[1]
    pred = jnp.moveaxis(preds, 1, -1).reshape(-1, C).astype(jnp.float32)
    ground = targets.reshape(-1, C).astype(jnp.float32)
    ref_vol = jnp.sum(ground, 0)
    intersect = jnp.sum(ground * pred, 0)
    seg_vol = jnp.sum(pred, 0)
    dice = (2.0 * intersect + 1e-05) / (ref_vol + seg_vol + 1.0 + 1e-05)
    return jnp.mean(-jnp.log(dice))


if __name__ == "__main__":
    key = jax.random.PRNGKey(0)
    k1, k2 = jax.random.split(key)

    N, C, H, W = 2, 4, 16, 16
    # preds: softmax probabilities over the class axis (NCHW, like PyTorch conv output).
    logits = jax.random.normal(k1, (N, C, H, W), dtype=jnp.float32)
    preds = jax.nn.softmax(logits, axis=1)
    # targets: one-hot ground truth, channel last, matching targets.view(-1, C).
    labels = jax.random.randint(k2, (N, H, W), 0, C)
    targets = jax.nn.one_hot(labels, C, dtype=jnp.float32)

    loss = jax.block_until_ready(sdice_loss(preds, targets))
    ref = jax.block_until_ready(sdice_loss_ref(preds, targets))
    assert jnp.allclose(loss, ref, rtol=1e-5, atol=1e-5), (loss, ref)

    print("KERNEL_OK")
</pallas_src>

<mosaic_0001>
module attributes {stable_mosaic.version = 11 : i64} {
  func.func @_sdice_partial_kernel(%arg0: i32, %arg1: i32, %arg2: memref<32x128xf32, #tpu.memory_space<vmem>>, %arg3: memref<32x128xf32, #tpu.memory_space<vmem>>, %arg4: memref<24x128xf32, #tpu.memory_space<vmem>>) attributes {dimension_semantics = [#tpu.dimension_semantics<parallel>, #tpu.dimension_semantics<arbitrary>], iteration_bounds = array<i64: 2, 1>, scalar_prefetch = 0 : i64, scratch_operands = 0 : i64, tpu.core_type = #tpu.core_type<tc>, window_params = [{transform_indices = @transform_0, window_bounds = array<i64: 32, 128>}, {transform_indices = @transform_1, window_bounds = array<i64: 32, 128>}, {transform_indices = @transform_2, window_bounds = array<i64: 24, 128>}]} {
    %c0 = arith.constant 0 : index
    %c0_0 = arith.constant 0 : index
    %0 = vector.load %arg2[%c0, %c0_0] : memref<32x128xf32, #tpu.memory_space<vmem>>, vector<32x128xf32>
    %c0_1 = arith.constant 0 : index
    %c0_2 = arith.constant 0 : index
    %1 = vector.load %arg3[%c0_1, %c0_2] : memref<32x128xf32, #tpu.memory_space<vmem>>, vector<32x128xf32>
    %2 = vector.shape_cast %1 : vector<32x128xf32> to vector<4x8x128xf32>
    %cst = arith.constant dense<0.000000e+00> : vector<8x128xf32>
    %3 = vector.multi_reduction <add>, %2, %cst [0] : vector<4x8x128xf32> to vector<8x128xf32>
    %4 = arith.mulf %1, %0 : vector<32x128xf32>
    %5 = vector.shape_cast %4 : vector<32x128xf32> to vector<4x8x128xf32>
    %cst_3 = arith.constant dense<0.000000e+00> : vector<8x128xf32>
    %6 = vector.multi_reduction <add>, %5, %cst_3 [0] : vector<4x8x128xf32> to vector<8x128xf32>
    %7 = vector.shape_cast %0 : vector<32x128xf32> to vector<4x8x128xf32>
    %cst_4 = arith.constant dense<0.000000e+00> : vector<8x128xf32>
    %8 = vector.multi_reduction <add>, %7, %cst_4 [0] : vector<4x8x128xf32> to vector<8x128xf32>
    %c0_i32 = arith.constant 0 : i32
    %9 = arith.cmpi eq, %arg1, %c0_i32 : i32
    %10 = arith.extui %9 : i1 to i32
    %c0_i32_5 = arith.constant 0 : i32
    %11 = arith.cmpi ne, %10, %c0_i32_5 : i32
    scf.if %11 {
      %cst_16 = arith.constant 0.000000e+00 : f32
      %21 = vector.broadcast %cst_16 : f32 to vector<24x128xf32>
      %c0_17 = arith.constant 0 : index
      %c0_18 = arith.constant 0 : index
      %22 = vector.load %arg4[%c0_17, %c0_18] : memref<24x128xf32, #tpu.memory_space<vmem>>, vector<24x128xf32>
      tpu.vector_store %arg4[%c0_17, %c0_18], %21 {strides = array<i32>} : memref<24x128xf32, #tpu.memory_space<vmem>>, vector<24x128xf32>,
    } else {
    }
    %c0_6 = arith.constant 0 : index
    %c0_7 = arith.constant 0 : index
    %12 = vector.load %arg4[%c0_6, %c0_7] : memref<24x128xf32, #tpu.memory_space<vmem>>, vector<8x128xf32>
    %13 = arith.addf %12, %3 : vector<8x128xf32>
    %c0_8 = arith.constant 0 : index
    %c0_9 = arith.constant 0 : index
    %14 = vector.load %arg4[%c0_8, %c0_9] : memref<24x128xf32, #tpu.memory_space<vmem>>, vector<8x128xf32>
    tpu.vector_store %arg4[%c0_8, %c0_9], %13 {strides = array<i32>} : memref<24x128xf32, #tpu.memory_space<vmem>>, vector<8x128xf32>,
    %c8 = arith.constant 8 : index
    %c0_10 = arith.constant 0 : index
    %15 = vector.load %arg4[%c8, %c0_10] : memref<24x128xf32, #tpu.memory_space<vmem>>, vector<8x128xf32>
    %16 = arith.addf %15, %6 : vector<8x128xf32>
    %c8_11 = arith.constant 8 : index
    %c0_12 = arith.constant 0 : index
    %17 = vector.load %arg4[%c8_11, %c0_12] : memref<24x128xf32, #tpu.memory_space<vmem>>, vector<8x128xf32>
    tpu.vector_store %arg4[%c8_11, %c0_12], %16 {strides = array<i32>} : memref<24x128xf32, #tpu.memory_space<vmem>>, vector<8x128xf32>,
    %c16 = arith.constant 16 : index
    %c0_13 = arith.constant 0 : index
    %18 = vector.load %arg4[%c16, %c0_13] : memref<24x128xf32, #tpu.memory_space<vmem>>, vector<8x128xf32>
    %19 = arith.addf %18, %8 : vector<8x128xf32>
    %c16_14 = arith.constant 16 : index
    %c0_15 = arith.constant 0 : index
    %20 = vector.load %arg4[%c16_14, %c0_15] : memref<24x128xf32, #tpu.memory_space<vmem>>, vector<8x128xf32>
    tpu.vector_store %arg4[%c16_14, %c0_15], %19 {strides = array<i32>} : memref<24x128xf32, #tpu.memory_space<vmem>>, vector<8x128xf32>,
    return
  }
  func.func @transform_0(%arg0: i32, %arg1: i32) -> (i32, i32) {
    %c1_i32 = arith.constant 1 : i32
    %0 = arith.muli %arg0, %c1_i32 : i32
    %1 = arith.addi %0, %arg1 : i32
    %c0_i32 = arith.constant 0 : i32
    %c0_i32_0 = arith.constant 0 : i32
    return %1, %c0_i32 : i32, i32
  }
  func.func @transform_1(%arg0: i32, %arg1: i32) -> (i32, i32) {
    %c1_i32 = arith.constant 1 : i32
    %0 = arith.muli %arg0, %c1_i32 : i32
    %1 = arith.addi %0, %arg1 : i32
    %c0_i32 = arith.constant 0 : i32
    %c0_i32_0 = arith.constant 0 : i32
    return %1, %c0_i32 : i32, i32
  }
  func.func @transform_2(%arg0: i32, %arg1: i32) -> (i32, i32) {
    %c0_i32 = arith.constant 0 : i32
    %c0_i32_0 = arith.constant 0 : i32
    return %arg0, %c0_i32 : i32, i32
  }
}

</mosaic_0001>

<bundles_post_ra>
// kernel: tpu_custom_call.1
= control target key start
LH: loop header
LB: loop body
LE: loop exit
PB: predicated region body
PF: predicated region fallthrough
CT: control target
= control target key end

     0   :  { %7 = vsyncpa [#allocation3], 0  ;;  %s789_s0 = inlined_call_operand.hbm [shape: f32[64,128], index: 0, kind: input, shape index: {}]   ;;  %s790_s1 = inlined_call_operand.hbm [shape: f32[64,128], index: 1, kind: input, shape index: {}]   ;;  %s791_s2 = inlined_call_operand.hbm [shape: f32[48,128], index: 2, kind: output, shape index: {}]  }
   0x1   :  { %9 = vsyncpa [#allocation3 + $0x1], 0 }
   0x2   :  { %10 = vsyncpa [#allocation6], 0 }
   0x3   :  { %12 = vsyncpa [#allocation6 + $0x1], 0 }
   0x4   :  { %13 = vsyncpa [#allocation4], 0 }
   0x5   :  { %15 = vsyncpa [#allocation4 + $0x1], 0  ;;  %s647_s9 = smov 0   ;;  %s649_s10 = smov 0  }
   0x6   :  { %s651_s11 = smov 0   ;;  %s653_s12 = smov 0  }
   0x7   :  { %s655_s13 = smov 0   ;;  %s657_s14 = smov 0  }
   0x8 LB: > { %s388_s15 = sadd.s32 4294967295, %s626_s14   ;;  %s389_s16 = sadd.s32 4294967294, %s626_s14   ;;  %s626_s14 = sphi %s657_s14, %s21_s14   ;;  %s622_s13 = sphi %s655_s13, %s801_s13   ;;  %s618_s12 = sphi %s653_s12, %s800_s12   ;;  %s614_s11 = sphi %s651_s11, %s799_s11   ;;  %s610_s10 = sphi %s649_s10, %s798_s10   ;;  %s606_s9 = sphi %s647_s9, %s797_s9  }
   0x9   : > { %s33_s17 = sadd.s32 1, %s622_s13  ;;  %s42_s18 = sadd.s32 1, %s614_s11 }
   0xa   : > { %p35_p0 = scmp.ge.s32.totalorder %s33_s17, 2  ;;  %p49_p1 = scmp.ne.s32.totalorder %s614_s11, %s610_s10 }
   0xb   : > { %p50_p2 = scmp.eq.s32.totalorder %s626_s14, 0  ;;  %p55_p3 = scmp.ne.s32.totalorder %s610_s10, %s606_s9 }
   0xc   : > { %s803_s17 = smov (%p35_p0, %s33_s17), 0  ;;  %p56_p5 = scmp.eq.s32.totalorder %s388_s15, 0 }
   0xd   : > { %p688_p4 = por %p50_p2, %p49_p1  ;;  %s39_s20 = ssub.s32 %s622_s13, %s803_s17 }
   0xe   : > { %p107_p6 = scmp.eq.s32.totalorder %s388_s15, 1  ;;  %p40_p7 = scmp.eq.s32.totalorder %s39_s20, 0 }
   0xf   : > { %p694_p8 = por %p56_p5, %p55_p3  ;;  %p113_p10 = scmp.eq.s32.totalorder %s389_s16, 1 }
  0x10   : > { %p698_p9 = por %p107_p6, %p49_p1  ;;  %p391_p12 = scmp.ge.s32.totalorder %s626_s14, 2 }
  0x11   : > { %s703_s23 = scalar_select %p40_p7, %s614_s11, %s42_s18  }
  0x12   : > { %p705_p11 = por %p113_p10, %p55_p3  ;;  %p425_p13 = scmp.lt.s32.totalorder %s626_s14, 2 }
  0x13   : > { %s712_s25 = sand.u32 1, %s614_s11   ;;  %s404_s27 = sshll.u32 %s622_s13, 5 }
  0x14   : > { %s392_s26 = sshll.u32 %s712_s25, 5  ;;  %s143_s30 = scalar_lea.hbm %s789_s0, %s404_s27 }
  0x15   : > { %s137_s3 = scalar_lea.vmem [#allocation2], %s392_s26  ;;  %s144_s5 = sshll.u32 %s143_s30, 4  ;;  %s145_s5 = int_to_ptr.hbm [resolvable:$true] %s144_s5 }
  0x16   : > { %s146_s4 = sshll.u32 %s137_s3, 4  ;;  %p721_p0 = pnand %p425_p13, %p688_p4  ;;  %s147_s4 = int_to_ptr.vmem [resolvable:$true] %s146_s4 }
  0x17   : > { %p398_p1 = scmp.ge.s32.totalorder %s626_s14, 1  ;;  %s134_s7 = scalar_lea.sflag [#allocation3], %s712_s25 }
  0x18   : > { %s628_s8 = smov 128   ;;  %s629_s15 = smov 8  }
  0x19   : > { %417 = dma.hbm_to_vmem [thread:$0]  (!%p721_p0), %s145_s5, 512, %s147_s4, %s134_s7, %s628_s8, %s628_s8, %s629_s15  }
  0x1a   : > { %p177_p2 = scmp.lt.s32.totalorder %s626_s14, 3  ;;  %s166_s20 = scalar_lea.hbm %s790_s1, %s404_s27 }
  0x1b   : > { %s167_s28 = sshll.u32 %s166_s20, 4  ;;  %s160_s19 = scalar_lea.vmem [#allocation5], %s392_s26  ;;  %s168_s28 = int_to_ptr.hbm [resolvable:$true] %s167_s28 }
  0x1c   : > { %p178_p3 = pnand %p398_p1, %p177_p2  ;;  %s169_s29 = sshll.u32 %s160_s19, 4  ;;  %s170_s29 = int_to_ptr.vmem [resolvable:$true] %s169_s29 }
  0x1d   : > { %s157_s30 = scalar_lea.sflag [#allocation6], %s712_s25  ;;  %s737_s3 = sand.u32 (!%p178_p3), 1, %s610_s10  }
  0x1e   : > { %420 = dma.hbm_to_vmem [thread:$0]  (!%p721_p0), %s168_s28, 512, %s170_s29, %s157_s30, %s628_s8, %s628_s8, %s629_s15  }
  0x1f   : > { %181 = sbr.rel (%p178_p3) target bundleno = 57 (0x39), region = 28  ;;  %s399_s4 = sshll.u32 (!%p178_p3), %s737_s3, 5 }
  0x20   : > { %s184_s5 = scalar_lea.sflag (!%p178_p3), [#allocation3], %s737_s3  ;;  %s187_s7 = scalar_lea.vmem (!%p178_p3), [#allocation2], %s399_s4 }
  0x24   : > { %593 = dma.done.wait (%p694_p8), %s184_s5, 512  }
  0x25   : > { %595 = vsyncadd (%p694_p8), %s184_s5, 4294966784  ;;  %s194_s25 = scalar_lea.sflag [#allocation6], %s737_s3  ;;  %s197_s26 = scalar_lea.vmem [#allocation5], %s399_s4 }
  0x26   : > { %597 = dma.done.wait (%p694_p8), %s194_s25, 512  }
  0x27   : > { %599 = vsyncadd (%p694_p8), %s194_s25, 4294966784  ;;  %s407_s27 = smul.u32 24, %s737_s3  ;;  %v233_v0 = vld [vmem:[%s197_s26] sm:$0xff]  ;;  %v234_v1 = vld [vmem:[%s197_s26 + $0x8] sm:$0xff]  ;;  %s267_s20 = scalar_lea.sflag [#allocation4], %s737_s3 }
  0x28   : > { %v235_v2 = vld [vmem:[%s197_s26 + $0x10] sm:$0xff]  ;;  %s406_s6 = smul.u32 24, %s618_s12  ;;  %v236_v3 = vld [vmem:[%s197_s26 + $0x18] sm:$0xff]  ;;  %v237_v4 = vadd.f32 %v234_v1, %v233_v0  ;;  %v229_v5 = vld [vmem:[%s187_s7] sm:$0xff]  ;;  %s560_s4 = scalar_lea.hbm %s791_s2, 48 }
  0x29   : > { %v230_v6 = vld [vmem:[%s187_s7 + $0x8] sm:$0xff]  ;;  %v231_v7 = vld [vmem:[%s187_s7 + $0x10] sm:$0xff]  ;;  %v232_v8 = vld [vmem:[%s187_s7 + $0x18] sm:$0xff]  ;;  %v240_v9 = vmul.f32 %v233_v0, %v229_v5  ;;  %s223_s12 = scalar_lea.vmem [#allocation7], %s407_s27 }
  0x2a   : > { %v241_v10 = vmul.f32 %v234_v1, %v230_v6  ;;  %v247_v11 = vadd.f32 %v230_v6, %v229_v5  ;;  %v238_v12 = vadd.f32 %v237_v4, %v235_v2  ;;  %v242_v13 = vmul.f32 %v235_v2, %v231_v7  ;;  %s278_s15 = scalar_lea.hbm %s791_s2, %s406_s6  ;;  %s279_s16 = sshll.u32 %s223_s12, 4  ;;  %s280_s16 = int_to_ptr.vmem [resolvable:$true] %s279_s16 }
  0x2b   : > { %v243_v14 = vmul.f32 %v236_v3, %v232_v8  ;;  %s281_s18 = sshll.u32 %s278_s15, 4  ;;  %s282_s18 = int_to_ptr.hbm [resolvable:$true] %s281_s18 }
  0x2c   : > { %v244_v15 = vadd.f32 %v241_v10, %v240_v9  ;;  %v248_v16 = vadd.f32 %v247_v11, %v231_v7  ;;  %v239_v17 = vadd.f32 %v238_v12, %v236_v3  ;;  %s554_s28 = sshra.s32 %s282_s18, 4  ;;  %s555_s28 = int_to_ptr.hbm [resolvable:$true] %s554_s28 }
  0x2d   : > { %s556_s19 = scalar_lea.hbm %s555_s28, 24  ;;  %p561_p7 = scmp.lt.s32.totalorder %s555_s28, %s791_s2 }
  0x2e   : > { %v245_v18 = vadd.f32 %v244_v15, %v242_v13  ;;  %v249_v19 = vadd.f32 %v248_v16, %v232_v8  ;;  %259 = vst [vmem:[%s223_s12] sm:$0xff] %v239_v17  ;;  %p557_p4 = scmp.ne.s32.totalorder %s555_s28, %s556_s19  ;;  %p562_p8 = scmp.lt.s32.totalorder %s560_s4, %s556_s19 }
  0x30   : > { %v246_v20 = vadd.f32 %v245_v18, %v243_v14  ;;  %265 = vst [vmem:[%s223_s12 + $0x10] sm:$0xff] %v249_v19  ;;  %p558_p5 = pnand %p557_p4, %p698_p9  ;;  %p563_p10 = por %p562_p8, %p561_p7 }
  0x32   : > { %262 = vst [vmem:[%s223_s12 + $0x8] sm:$0xff] %v246_v20  ;;  %p559_p6 = pneg %p558_p5 }
  0x34   : > { %p564_p13 = pnand %p563_p10, %p559_p6 }
  0x36   : > { %567 = shalt.err (!%p564_p13)
}
  0x37   : > { %s630_s3 = smov 128   ;;  %s631_s25 = smov 8  }
  0x38   : > { %412 = dma.vmem_to_hbm [thread:$0]  (%p698_p9), %s280_s16, 384, %s282_s18, %s267_s20, %s630_s3, %s630_s3, %s631_s25  }
  0x39 PF: > { %s296_s26 = sand.u32 1, %s606_s9   ;;  %p422_p0 = pnand %p391_p12, %p705_p11 }
  0x3a   : > { %s297_s27 = scalar_lea.sflag [#allocation4], %s296_s26 }
  0x3b   : > { %p423_p1 = pneg %p422_p0 }
  0x3d   : > { %601 = dma.done.wait (%p423_p1), %s297_s27, 384  }
  0x3e   : > { %603 = vsyncadd (%p423_p1), %s297_s27, 4294966912  ;;  %s21_s14 = sadd.s32 1, %s626_s14   ;;  %s797_s9 = smov %s610_s10 }
  0x3f   : > { %p18_p2 = scmp.ge.s32.totalorder %s21_s14, 4   ;;  %s798_s10 = smov %s614_s11 }
  0x40   : > { %s799_s11 = smov %s703_s23  ;;  %s800_s12 = smov %s622_s13 }
  0x41   : > { %s801_s13 = smov %s803_s17  ;;  %20 = sbr.rel (!%p18_p2) target bundleno = 8 (0x8), region = 90 }
  0x46   :  { %303 = vsyncpa [#allocation3], 1 }
  0x47   :  { %305 = vsyncpa [#allocation3 + $0x1], 1 }
  0x48   :  { %306 = vsyncpa [#allocation6], 1 }
  0x49   :  { %308 = vsyncpa [#allocation6 + $0x1], 1 }
  0x4a   :  { %309 = vsyncpa [#allocation4], 1 }
  0x4b   :  { %311 = vsyncpa [#allocation4 + $0x1], 1 }

</bundles_post_ra>
